<compile_context>
chip_gen: v5e
topology: v5e:2x2
jax: 0.10.0
libtpu: 0.0.40
codegen_flags: <defaults>
</compile_context>

<pallas_src>
import jax
import jax.numpy as jnp
from jax.experimental import pallas as pl
from jax.experimental.pallas import tpu as pltpu

_LANE = 1024        # lane-dense trailing dim (multiple of 128)
_BLOCK_ROWS = 512   # 512 x 1024 x 4B = 2 MiB per block


def _copy_kernel(x_ref, o_ref):
    # The entire "forward" of COPA_model_baseline: o = x.
    o_ref[...] = x_ref[...]


def _copy_2d(x2d, block_rows):
    """Tiled lane-dense copy of a (rows, _LANE) slab."""
    rows, lane = x2d.shape
    grid = rows // block_rows
    nbytes = x2d.size * x2d.dtype.itemsize
    return pl.pallas_call(
        _copy_kernel,
        out_shape=jax.ShapeDtypeStruct((rows, lane), x2d.dtype),
        grid=(grid,),
        in_specs=[pl.BlockSpec((block_rows, lane), lambda i: (i, 0))],
        out_specs=pl.BlockSpec((block_rows, lane), lambda i: (i, 0)),
        input_output_aliases={0: 0},
        cost_estimate=pl.CostEstimate(
            flops=0, transcendentals=0, bytes_accessed=2 * nbytes),
        compiler_params=pltpu.CompilerParams(
            dimension_semantics=("parallel",),
        ),
    )(x2d)


@jax.jit
def copa_model_baseline_forward(x):
    """Identity forward pass (COPA_model_baseline.forward) as a Pallas kernel."""
    orig_shape = x.shape
    orig_dtype = x.dtype
    itemsize = x.dtype.itemsize

    flat = x.reshape(-1)
    n = flat.size

    # Pack sub-32-bit dtypes into 32-bit words when the byte count allows it.
    packed = False
    if itemsize < 4 and (n * itemsize) % 4 == 0:
        per_word = 4 // itemsize
        flat = jax.lax.bitcast_convert_type(
            flat.reshape(n // per_word, per_word), jnp.uint32)
        packed = True

    m = flat.size  # number of words actually copied

    # Pad up to a whole number of lane-dense rows (and whole blocks if large).
    rows = pl.cdiv(m, _LANE)
    if rows >= _BLOCK_ROWS:
        rows = pl.cdiv(rows, _BLOCK_ROWS) * _BLOCK_ROWS
        block_rows = _BLOCK_ROWS
    else:
        block_rows = rows
    padded = rows * _LANE
    if padded != m:
        flat = jnp.pad(flat, (0, padded - m))

    x2d = flat.reshape(rows, _LANE)
    y2d = _copy_2d(x2d, block_rows)
    y = y2d.reshape(-1)[:m]

    if packed:
        y = jax.lax.bitcast_convert_type(y, orig_dtype).reshape(-1)[:n]

    return y.reshape(orig_shape)


if __name__ == "__main__":
    key = jax.random.PRNGKey(0)
    x = jax.random.normal(key, (2, 4, 16, 16), dtype=jnp.float32)

    y = copa_model_baseline_forward(x)
    y = jax.block_until_ready(y)

    assert y.shape == x.shape
    assert y.dtype == x.dtype
    assert bool(jnp.all(y == x))

    print("KERNEL_OK")
</pallas_src>

<mosaic_0001>
module attributes {stable_mosaic.version = 11 : i64} {
  func.func @_copy_kernel(%arg0: i32, %arg1: memref<2x1024xf32, #tpu.memory_space<vmem>>, %arg2: memref<2x1024xf32, #tpu.memory_space<vmem>>) attributes {dimension_semantics = [#tpu.dimension_semantics<parallel>], iteration_bounds = array<i64: 1>, scalar_prefetch = 0 : i64, scratch_operands = 0 : i64, tpu.core_type = #tpu.core_type<tc>, window_params = [{transform_indices = @transform_0, window_bounds = array<i64: 2, 1024>}, {transform_indices = @transform_1, window_bounds = array<i64: 2, 1024>}]} {
    %c0 = arith.constant 0 : index
    %c0_0 = arith.constant 0 : index
    %0 = vector.load %arg1[%c0, %c0_0] : memref<2x1024xf32, #tpu.memory_space<vmem>>, vector<2x1024xf32>
    %c0_1 = arith.constant 0 : index
    %c0_2 = arith.constant 0 : index
    %1 = vector.load %arg2[%c0_1, %c0_2] : memref<2x1024xf32, #tpu.memory_space<vmem>>, vector<2x1024xf32>
    tpu.vector_store %arg2[%c0_1, %c0_2], %0 {strides = array<i32>} : memref<2x1024xf32, #tpu.memory_space<vmem>>, vector<2x1024xf32>,
    return
  }
  func.func @transform_0(%arg0: i32) -> (i32, i32) {
    %c0_i32 = arith.constant 0 : i32
    %c0_i32_0 = arith.constant 0 : i32
    return %arg0, %c0_i32 : i32, i32
  }
  func.func @transform_1(%arg0: i32) -> (i32, i32) {
    %c0_i32 = arith.constant 0 : i32
    %c0_i32_0 = arith.constant 0 : i32
    return %arg0, %c0_i32 : i32, i32
  }
}

</mosaic_0001>

<bundles_post_ra>
// kernel: copa_model_baseline_forward.1
= control target key start
LH: loop header
LB: loop body
LE: loop exit
PB: predicated region body
PF: predicated region fallthrough
CT: control target
= control target key end

     0   :  { %s38_s0 = inlined_call_operand.vmem [shape: f32[2,1024], index: 0, kind: input, shape index: {}, may-alias: {0,1}]   ;;  %s39_s1 = inlined_call_operand.vmem [shape: f32[2,1024], index: 1, kind: output, shape index: {}, may-alias: {0,1}]  }
   0x1   :  { %v8_v0 = vld [vmem:[%s38_s0] sm:$0xff]  ;;  %v9_v1 = vld [vmem:[%s38_s0 + $0x8] sm:$0xff] }
   0x2   :  { %10 = vst [vmem:[%s39_s1] sm:$0xff] %v8_v0 }
   0x3   :  { %11 = vst [vmem:[%s39_s1 + $0x8] sm:$0xff] %v9_v1 }

</bundles_post_ra>
